<compile_context>
chip_gen: v7x
topology: tpu7x:2x2x1
jax: 0.10.0
libtpu: 0.0.40
codegen_flags: <defaults>
</compile_context>

<pallas_src>
import functools

import jax
import jax.numpy as jnp
from jax.experimental import pallas as pl
from jax.experimental.pallas import tpu as pltpu


def _decoder_kernel(idx_ref, fused_ref, out_ref, *, context_size, tile_n):
    # idx_ref:   SMEM (N_pad*K,) int32  flattened, pre-offset indices (scalar prefetch)
    # fused_ref: VMEM (K*Vp, D)  f32    pre-fused (embedding @ conv-tap) table, resident
    # out_ref:   VMEM (tile_n, D) f32   output tile
    base = pl.program_id(0) * (tile_n * context_size)

    @pl.loop(0, tile_n)
    def _(n):
        off = base + n * context_size
        # Gather the K fused rows for this token's context and sum them (VPU add).
        acc = fused_ref[pl.ds(idx_ref[off], 1), :]            # (1, D)
        for kk in range(1, context_size):                      # K is tiny (2): unrolled
            acc = acc + fused_ref[pl.ds(idx_ref[off + kk], 1), :]
        out_ref[pl.ds(n, 1), :] = jnp.maximum(acc, 0.0)        # ReLU


def prepare_fused_table(emb, w_grouped):
    """Fold Embedding + grouped Conv1d weights into one stacked lookup table (offline).

    emb:       (V, D) f32 embedding table (padding_idx row already zeroed).
    w_grouped: (D_out, group_in, K) grouped Conv1d weight (groups = D_out // group_in).

    Returns:
      fused:  (K * Vp, D_out) f32, Vp = V rounded up to a multiple of 8;
              fused[k * Vp + v, :] = emb[v, :] @ W_tap[k]   (zero for padded v).
      wdense: (D_out, D_in, K) dense conv weight (used only by the pure-JAX reference).
    """
    v, d = emb.shape
    d_out, group_in, k = w_grouped.shape

    # Expand grouped weight to dense (zeros outside each group).
    c = jnp.arange(d_out)
    wdense = jnp.zeros((d_out, d, k), jnp.float32)
    for j in range(group_in):
        wdense = wdense.at[c, (c // group_in) * group_in + j, :].set(w_grouped[:, j, :])

    wt = jnp.transpose(wdense, (2, 1, 0))            # (K, D_in, D_out)
    vp = ((v + 7) // 8) * 8                          # sublane-aligned vocab blocks
    emb_p = jnp.pad(emb, ((0, vp - v), (0, 0)))      # padded rows zero -> never selected
    fused = jnp.einsum("vd,kdc->kvc", emb_p, wt)     # (K, Vp, D_out)
    return fused.reshape(k * vp, d_out), wdense


def _choose_tile_n(n, tile_n_max):
    """Adaptive row tile: big enough to amortize step overhead, small enough not to
    over-pad tiny batches, and split into >=2 grid steps when possible (v7x megacore)."""
    n_r8 = ((n + 7) // 8) * 8
    t = max(8, min(tile_n_max, n_r8))
    if n_r8 >= 16 and -(-n_r8 // t) < 2:
        t = max(8, ((n_r8 // 2 + 7) // 8) * 8)
    return t


@functools.partial(jax.jit, static_argnames=("tile_n",))
def foo_forward(x, fused, *, tile_n=256):
    """x: (N, K) int32, fused: (K*Vp, D) f32  ->  (N, 1, D) f32, matching Foo.forward."""
    n, k = x.shape
    kv, d = fused.shape
    assert kv % k == 0
    vp = kv // k

    # Offset each context position into its block of the stacked fused table,
    # flatten row-major -> SMEM scalar-prefetch array (1D keeps SMEM padding small).
    x_off = x.astype(jnp.int32) + (jnp.arange(k, dtype=jnp.int32) * vp)[None, :]

    t = _choose_tile_n(n, tile_n)
    n_pad = pl.cdiv(n, t) * t
    # Padded rows index 0 (in-range, blank row) and are sliced off below.
    idx_flat = jnp.pad(x_off, ((0, n_pad - n), (0, 0))).reshape(-1)

    grid = (n_pad // t,)

    # VMEM budget: resident fused table (single copy) + double-buffered output tile,
    # plus headroom for compiler temporaries.
    needed = kv * d * 4 + 2 * (t * d * 4)
    vmem_limit = int(min(max(needed + (4 << 20), 16 << 20), 96 << 20))

    # Gather path: essentially no MXU FLOPs; traffic is row reads + output writes.
    cost = pl.CostEstimate(
        flops=n_pad * k * d,
        transcendentals=0,
        bytes_accessed=n_pad * k * d * 4 + n_pad * d * 4 + kv * d * 4 + n_pad * k * 4,
    )

    out = pl.pallas_call(
        functools.partial(_decoder_kernel, context_size=k, tile_n=t),
        out_shape=jax.ShapeDtypeStruct((n_pad, d), jnp.float32),
        grid_spec=pltpu.PrefetchScalarGridSpec(
            num_scalar_prefetch=1,                     # idx_flat -> SMEM
            grid=grid,
            in_specs=[
                # Grid-invariant fused table: whole array resident in VMEM,
                # no per-step DMA, no double-buffering.
                pl.BlockSpec(memory_space=pltpu.MemorySpace.VMEM),
            ],
            out_specs=pl.BlockSpec((t, d), lambda i, idx: (i, 0)),
        ),
        compiler_params=pltpu.CompilerParams(
            dimension_semantics=("parallel",),         # batch tiles shard across TCs
            vmem_limit_bytes=vmem_limit,
        ),
        cost_estimate=cost,
    )(idx_flat, fused)

    return out[:n][:, None, :]  # (N, 1, D) == (N, T_out=1, decoder_dim)


if __name__ == "__main__":
    # Small shapes consistent with the module (defaults are vocab=500, D=512, K=2).
    vocab_size = 64
    decoder_dim = 128
    blank_id = 0
    context_size = 2
    batch = 16

    key = jax.random.PRNGKey(0)
    k_emb, k_conv, k_x = jax.random.split(key, 3)

    # nn.Embedding(vocab, D, padding_idx=blank_id): padding row is zeros.
    emb = jax.random.normal(k_emb, (vocab_size, decoder_dim), jnp.float32) * 0.1
    emb = emb.at[blank_id].set(0.0)

    # nn.Conv1d(D, D, kernel_size=context_size, groups=D//4, bias=False)
    group_in = 4  # in-channels per group
    w_grouped = (
        jax.random.normal(
            k_conv, (decoder_dim, group_in, context_size), jnp.float32
        )
        * 0.1
    )

    fused, wdense = prepare_fused_table(emb, w_grouped)

    x = jax.random.randint(
        k_x, (batch, context_size), minval=0, maxval=vocab_size, dtype=jnp.int32
    )

    y = foo_forward(x, fused)
    y = jax.block_until_ready(y)
    assert y.shape == (batch, 1, decoder_dim), y.shape
    assert y.dtype == jnp.float32

    # Pure-JAX reference of the same semantics (embedding -> grouped conv -> relu).
    emb_out = emb[x]  # (N, K, D)
    ref = jnp.maximum(jnp.einsum("nkd,cdk->nc", emb_out, wdense), 0.0)[:, None, :]
    assert jnp.allclose(y, ref, atol=1e-4, rtol=1e-4), float(jnp.max(jnp.abs(y - ref)))

    print("KERNEL_OK")
</pallas_src>

<mosaic_0001>
module attributes {stable_mosaic.version = 11 : i64} {
  func.func @_decoder_kernel(%arg0: i32, %arg1: memref<32xi32, #tpu.memory_space<smem>>, %arg2: memref<128x128xf32, #tpu.memory_space<vmem>>, %arg3: memref<8x128xf32, #tpu.memory_space<vmem>>) attributes {dimension_semantics = [#tpu.dimension_semantics<parallel>], iteration_bounds = array<i64: 2>, scalar_prefetch = 1 : i64, scratch_operands = 0 : i64, tpu.core_type = #tpu.core_type<tc>, window_params = [{pipeline_mode = #tpu.pipeline_mode<synchronous>, transform_indices = @transform_0, window_bounds = array<i64: 128, 128>}, {transform_indices = @transform_1, window_bounds = array<i64: 8, 128>}]} {
    %c16_i32 = arith.constant 16 : i32
    %0 = arith.muli %arg0, %c16_i32 : i32
    %c0_i32 = arith.constant 0 : i32
    %c8_i32 = arith.constant 8 : i32
    %1 = arith.addi %c0_i32, %c8_i32 : i32
    %c1_i32 = arith.constant 1 : i32
    scf.for %arg4 = %c0_i32 to %1 step %c1_i32  : i32 {
      %c1_i32_1 = arith.constant 1 : i32
      %2 = arith.muli %arg4, %c1_i32_1 : i32
      %c0_i32_2 = arith.constant 0 : i32
      %3 = arith.addi %c0_i32_2, %2 : i32
      %c2_i32 = arith.constant 2 : i32
      %4 = arith.muli %3, %c2_i32 : i32
      %5 = arith.addi %0, %4 : i32
      %6 = arith.index_cast %5 : i32 to index
      %7 = memref.load %arg1[%6] : memref<32xi32, #tpu.memory_space<smem>>
      %8 = arith.index_cast %7 : i32 to index
      %c0 = arith.constant 0 : index
      %9 = vector.load %arg2[%8, %c0] : memref<128x128xf32, #tpu.memory_space<vmem>>, vector<1x128xf32>
      %c1_i32_3 = arith.constant 1 : i32
      %10 = arith.addi %5, %c1_i32_3 : i32
      %11 = arith.index_cast %10 : i32 to index
      %12 = memref.load %arg1[%11] : memref<32xi32, #tpu.memory_space<smem>>
      %13 = arith.index_cast %12 : i32 to index
      %c0_4 = arith.constant 0 : index
      %14 = vector.load %arg2[%13, %c0_4] : memref<128x128xf32, #tpu.memory_space<vmem>>, vector<1x128xf32>
      %15 = arith.addf %9, %14 : vector<1x128xf32>
      %cst = arith.constant 0.000000e+00 : f32
      %16 = vector.broadcast %cst : f32 to vector<1x128xf32>
      %17 = arith.maximumf %15, %16 : vector<1x128xf32>
      %18 = arith.index_cast %3 : i32 to index
      %c0_5 = arith.constant 0 : index
      %19 = vector.load %arg3[%18, %c0_5] : memref<8x128xf32, #tpu.memory_space<vmem>>, vector<1x128xf32>
      tpu.vector_store %arg3[%18, %c0_5], %17 {strides = array<i32>} : memref<8x128xf32, #tpu.memory_space<vmem>>, vector<1x128xf32>,
    }
    %c8_i32_0 = arith.constant 8 : i32
    return
  }
  func.func @transform_0(%arg0: i32, %arg1: memref<32xi32, #tpu.memory_space<smem>>) -> (i32, i32) {
    %c0_i32 = arith.constant 0 : i32
    %c0_i32_0 = arith.constant 0 : i32
    %c0_i32_1 = arith.constant 0 : i32
    return %c0_i32, %c0_i32_0 : i32, i32
  }
  func.func @transform_1(%arg0: i32, %arg1: memref<32xi32, #tpu.memory_space<smem>>) -> (i32, i32) {
    %c0_i32 = arith.constant 0 : i32
    %c0_i32_0 = arith.constant 0 : i32
    return %arg0, %c0_i32 : i32, i32
  }
}

</mosaic_0001>

<bundles_post_ra>
// kernel: foo_forward.1
= control target key start
LH: loop header
LB: loop body
LE: loop exit
PB: predicated region body
PF: predicated region fallthrough
CT: control target
= control target key end

     0   :  { %s557_s0 = inlined_call_operand.vmem [shape: s32[32], index: 0, kind: input, shape index: {}]   ;;  %s558_s1 = inlined_call_operand.hbm [shape: f32[128,128], index: 1, kind: input, shape index: {}]   ;;  %s559_s2 = inlined_call_operand.hbm [shape: f32[16,128], index: 2, kind: output, shape index: {}]  }
   0x1   :  { %s7_s11 = sshll.u32 %s557_s0, 4  ;;  %s8_s11 = int_to_ptr.vmem [resolvable:$true] %s7_s11 }
   0x2   :  { %s291_s12 = scalar_lea.vmem %s8_s11, 16  ;;  %p296_p1 = scmp.lt.s32.totalorder %s8_s11, %s8_s11 }
   0x3   :  { %p292_p0 = scmp.ne.s32.totalorder %s8_s11, %s291_s12  ;;  %p297_p2 = scmp.lt.s32.totalorder %s291_s12, %s291_s12 }
   0x5   :  { %p298_p3 = por %p297_p2, %p296_p1 }
   0x7   :  { %p299_p4 = pnand %p298_p3, %p292_p0 }
   0x9   :  { %302 = shalt.err (!%p299_p4)  }
   0xa   :  { %s409_s13 = smov [#allocation3]  }
   0xb   :  { %10 = dma.vmem_to_smem %s8_s11, 16, %s409_s13, [#allocation2] }
   0xc   :  { %379 = dma.done.wait [#allocation2], 16 }
   0xd   :  { %380 = vsyncadd [#allocation2], 4294967280 }
   0xe   :  { %12 = sfence }
   0xf   :  { %13 = vsyncpa [#allocation5], 0 }
  0x10   :  { %14 = vsyncpa [#allocation6], 0 }
  0x11   :  { %16 = vsyncpa [#allocation6 + $0x1], 0  ;;  %s432_s14 = smov 0   ;;  %s434_s15 = smov 0  }
  0x12   :  { %s436_s0 = smov 0   ;;  %s438_s16 = smov 0  }
  0x13 LB: > { %s453_s17 = sadd.s32 4294967295, %s403_s16   ;;  %s218_s18 = sadd.s32 4294967294, %s403_s16   ;;  %s403_s16 = sphi %s438_s16, %s575_s16   ;;  %s399_s0 = sphi %s436_s0, %s574_s0   ;;  %s395_s15 = sphi %s434_s15, %s573_s15   ;;  %s391_s14 = sphi %s432_s14, %s572_s14  }
  0x14   : > { %s457_s19 = sadd.s32 1, %s403_s16   ;;  %s50_s20 = sadd.s32 1, %s399_s0 }
  0x15   : > { %s47_s21 = ssub.s32 %s403_s16, %s457_s19  ;;  %p60_p5 = scmp.ne.s32.totalorder %s399_s0, %s395_s15 }
  0x16   : > { %p48_p6 = scmp.eq.s32.totalorder %s47_s21, 0  ;;  %p61_p7 = scmp.eq.s32.totalorder %s453_s17, 1 }
  0x17   : > { %p66_p8 = scmp.ne.s32.totalorder %s395_s15, %s391_s14  ;;  %p67_p9 = scmp.eq.s32.totalorder %s218_s18, 1 }
  0x18   : > { %s468_s22 = scalar_select %p48_p6, %s399_s0, %s50_s20  }
  0x19   : > { %p470_p10 = por %p61_p7, %p60_p5  ;;  %p474_p11 = por %p67_p9, %p66_p8 }
  0x1a   : > { %p219_p12 = scmp.ge.s32.totalorder %s403_s16, 1  ;;  %p74_p13 = scmp.lt.s32.totalorder %s403_s16, 3 }
  0x1b   : > { %s563_s23 = scalar_select %p470_p10, 1, 0 }
  0x1c   : > { %s564_s24 = scalar_select %p474_p11, 1, 0 }
  0x1d   : > { %p560_p0 = scmp.eq.s32.totalorder %s453_s17, 0  ;;  %p481_p1 = pnand %p219_p12, %p74_p13 }
  0x1e   : > { %s410_s26 = smov [#allocation4]   ;;  %s303_s3 = scalar_lea.hbm %s558_s1, 2048 }
  0x1f   : > { %s565_s25 = scalar_select %p481_p1, 1, 0 }
  0x20   : > { %s86_s27 = sshll.u32 %s410_s26, 4  ;;  %p236_p2 = pneg %p481_p1  ;;  %s87_s27 = int_to_ptr.vmem [resolvable:$true] %s86_s27 }
  0x21   : > { %p304_p4 = scmp.ne.s32.totalorder %s558_s1, %s303_s3  ;;  %p310_p8 = scmp.lt.u32.totalorder %s303_s3, %s558_s1 }
  0x22   : > { %p489_p3 = pnand %p560_p0, %p236_p2 }
  0x24   : > { %p305_p5 = pneg %p489_p3 }
  0x26   : > { %p306_p6 = pnand %p305_p5, %p304_p4 }
  0x28   : > { %p307_p7 = pneg %p306_p6 }
  0x2a   : > { %p312_p9 = pnand %p310_p8, %p307_p7 }
  0x2c   : > { %315 = shalt.err (!%p312_p9)
}
  0x2d   : > { %s316_s8 = scalar_lea.vmem %s87_s27, 2048  ;;  %p324_p0 = scmp.lt.s32.totalorder %s87_s27, %s87_s27 }
  0x2e   : > { %p317_p12 = scmp.ne.s32.totalorder %s87_s27, %s316_s8  ;;  %p325_p11 = scmp.lt.s32.totalorder %s316_s8, %s316_s8 }
  0x30   : > { %p319_p13 = pnand %p317_p12, %p305_p5  ;;  %p326_p10 = por %p325_p11, %p324_p0 }
  0x32   : > { %p320_p2 = pneg %p319_p13 }
  0x34   : > { %p327_p1 = pnand %p326_p10, %p320_p2 }
  0x36   : > { %330 = shalt.err (!%p327_p1)
}
  0x37   : > { %s411_s9 = smov 128   ;;  %s412_s10 = smov 8  }
  0x38   : > { %239 = dma.hbm_to_vmem [thread:$0]  (!%p489_p3), %s558_s1, 2048, %s87_s27, [#allocation5], %s411_s9, %s411_s9, %s412_s10  }
  0x39   : > { %p567_p4 = scmp.ne.s32.totalorder %s565_s25, 0 }
  0x3a   : > { %p568_p6 = scmp.eq.s32.totalorder (!%p567_p4), %s453_s17, 0 }
  0x3b   : > { %102 = sbr.rel (%p567_p4) target bundleno = 100 (0x64), region = 24 }
  0x42   : > { %382 = dma.done.wait (%p568_p6), [#allocation5], 2048   ;;  %p569_p5 = pmov %p568_p6 }
  0x43   : > { %s114_s13 = sand.u32 1, %s395_s15   ;;  %s224_s18 = sshll.u32 %s453_s17, 4 }
  0x44   : > { %384 = vsyncadd (%p569_p5), [#allocation5], 4294965248  ;;  %s223_s20 = sshll.u32 %s114_s13, 3  ;;  %s405_s26 = smov 0  }
  0x45   : > { %s116_s21 = scalar_lea.vmem [#allocation7], %s223_s20 }
  0x46 LB: >> { %s225_s27 = sshll.u32 %s407_s26, 1  ;;  %s135_s5 = scalar_lea.vmem %s116_s21, %s407_s26 [#allocation7]  ;;  %s407_s26 = sphi %s405_s26, %s123_s26  }
  0x47   : >> { %s125_s28 = sadd.s32 %s225_s27, %s224_s18  ;;  %s123_s26 = sadd.s32 1, %s407_s26  }
  0x48   : >> { %s126_s25 = sld [smem:[#allocation3 + %s125_s28]]  ;;  %s129_s29 = sadd.s32 1, %s125_s28 }
  0x49   : >> { %s130_s30 = sld [smem:[#allocation3 + %s129_s29]]  ;;  %p120_p10 = scmp.ge.s32.totalorder %s123_s26, 8  }
  0x4a   : > { %s227_s6 = sshll.u32 (%p120_p10), %s453_s17, 7  ;;  %s151_s10 = sshll.u32 (%p120_p10), %s116_s21, 4  ;;  %s152_s10 = int_to_ptr.vmem [resolvable:$true] %s151_s10 }
  0x4b   : > { %s521_s9 = scalar_lea.hbm (%p120_p10), %s559_s2, %s227_s6  ;;  %s138_s11 = scalar_lea.sflag (%p120_p10), [#allocation6], %s114_s13 }
  0x4c   : > { %s331_s12 = scalar_lea.vmem (%p120_p10), %s152_s10, 128  ;;  %p570_p0 = scmp.ne.s32.totalorder (%p120_p10), %s563_s23, 0 }
  0x4d   : > { %p332_p11 = scmp.ne.s32.totalorder (%p120_p10), %s152_s10, %s331_s12  ;;  %s413_s20 = smov (%p120_p10), [#allocation7]  }
  0x4e   : >> { %s127_s3 = scalar_lea.vmem [#allocation4], %s126_s25  ;;  %s335_s27 = sshll.u32 (%p120_p10), %s413_s20, 4  ;;  %s336_s27 = int_to_ptr.vmem [resolvable:$false] %s335_s27 }
  0x4f   : >> { %v128_v0 = vld [vmem:[%s127_s3] sm:$0x1]  ;;  %s131_s4 = scalar_lea.vmem [#allocation4], %s130_s30  ;;  %122 = sbr.rel (!%p120_p10) target bundleno = 70 (0x46), region = 71 }
  0x50   : >> { %v132_v1 = vld [vmem:[%s131_s4] sm:$0x1]  ;;  %p333_p1 = pnand (%p120_p10), %p332_p11, %p570_p0  ;;  %s337_s26 = scalar_lea.vmem (%p120_p10), %s336_s27, 256 }
  0x51   : >> { %v133_v2 = vadd.f32 %v132_v1, %v128_v0  ;;  %p338_p7 = scmp.lt.s32.totalorder (%p120_p10), %s152_s10, %s336_s27  ;;  %p339_p8 = scmp.lt.s32.totalorder (%p120_p10), %s337_s26, %s331_s12 }
  0x52   : > { %p334_p3 = pneg (%p120_p10), %p333_p1 }
  0x53   : >> { %v134_v3 = vmax.f32 %v133_v2, 0.0  ;;  %p340_p9 = por (%p120_p10), %p339_p8, %p338_p7 }
  0x55   : >> { %136 = vst [vmem:[%s135_s5] sm:$0x1] %v134_v3  ;;  %p341_p12 = pnand (%p120_p10), %p340_p9, %p334_p3 }
  0x57   : > { %344 = shalt.err (!%p341_p12)
}
  0x58   : > { %s345_s17 = scalar_lea.hbm %s521_s9, 128  ;;  %s349_s21 = scalar_lea.hbm %s559_s2, 256 }
  0x59   : > { %p346_p13 = scmp.ne.s32.totalorder %s521_s9, %s345_s17  ;;  %p350_p6 = scmp.lt.u32.totalorder %s521_s9, %s559_s2 }
  0x5a   : > { %p351_p5 = scmp.lt.u32.totalorder %s349_s21, %s345_s17  ;;  %p353_p11 = scmp.lt.u32.totalorder %s345_s17, %s521_s9 }
  0x5b   : > { %p347_p2 = pnand %p346_p13, %p570_p0 }
  0x5c   : > { %p352_p10 = por %p351_p5, %p350_p6 }
  0x5d   : > { %p348_p4 = pneg %p347_p2 }
  0x5e   : > { %p354_p1 = por %p353_p11, %p352_p10 }
  0x60   : > { %p355_p3 = pnand %p354_p1, %p348_p4 }
  0x62   : > { %358 = shalt.err (!%p355_p3)
}
  0x63   : > { %234 = dma.vmem_to_hbm [thread:$0]  (%p570_p0), %s152_s10, 128, %s521_s9, %s138_s11  }
  0x64 PF: > { %p246_p7 = scmp.ge.s32.totalorder %s403_s16, 2  ;;  %s163_s29 = sand.u32 1, %s391_s14  }
  0x65   : > { %p571_p8 = scmp.ne.s32.totalorder %s564_s24, 0  ;;  %s164_s30 = scalar_lea.sflag [#allocation6], %s163_s29 }
  0x67   : > { %p241_p9 = pnand %p246_p7, %p571_p8 }
  0x69   : > { %386 = dma.done.wait (!%p241_p9), %s164_s30, 128  }
  0x6a   : > { %388 = vsyncadd (!%p241_p9), %s164_s30, 4294967168  ;;  %p19_p12 = scmp.ge.s32.totalorder %s457_s19, 4   ;;  %s572_s14 = smov %s395_s15 }
  0x6b   : > { %s573_s15 = smov %s399_s0  ;;  %s574_s0 = smov %s468_s22 }
  0x6c   : > { %s575_s16 = smov %s457_s19  ;;  %21 = sbr.rel (!%p19_p12) target bundleno = 19 (0x13), region = 82 }
  0x73   :  { %169 = vsyncpa [#allocation5], 1 }
  0x74   :  { %171 = vsyncpa [#allocation5 + $0x1], 1 }
  0x75   :  { %172 = vsyncpa [#allocation6], 1 }
  0x76   :  { %174 = vsyncpa [#allocation6 + $0x1], 1 }

</bundles_post_ra>
